<compile_context>
chip_gen: v6e
topology: v6e:2x2x1
jax: 0.10.0
libtpu: 0.0.40
codegen_flags: <defaults>
</compile_context>

<pallas_src>
import functools

import jax
import jax.numpy as jnp
import numpy as np
from jax.experimental import pallas as pl
from jax.experimental.pallas import tpu as pltpu

EPS = 1e-6  # the PyTorch module passes eps=1e-06 explicitly


def _same_padding(kernel, dilation):
    return (kernel + (kernel - 1) * (dilation - 1) - 1) // 2


def _tap_masks(H, W, K, DIL, PAD):
    """Per-tap validity masks (K*K, H*W) in {0,1}: zero where the shifted source pixel
    falls outside the image (vertical out-of-range or row wrap).  Built once on host."""
    ys, xs = np.meshgrid(np.arange(H), np.arange(W), indexing="ij")
    m = np.zeros((K * K, H * W), np.float32)
    for ky in range(K):
        for kx in range(K):
            dy, dx = ky * DIL - PAD, kx * DIL - PAD
            valid = ((ys + dy >= 0) & (ys + dy < H) &
                     (xs + dx >= 0) & (xs + dx < W))
            m[ky * K + kx] = valid.reshape(-1).astype(np.float32)
    return m


def _make_kernel(H, W, C, NB, K, DIL, PAD, masks_np):
    HW = H * W
    needs_mask = [not bool(np.all(masks_np[t] == 1.0)) for t in range(K * K)]

    def inorm(h, g_ref, b_ref):
        # Two-pass InstanceNorm2d (biased variance, eps inside sqrt) == PyTorch semantics.
        mu = jnp.mean(h, axis=-1, keepdims=True)
        d = h - mu
        var = jnp.mean(d * d, axis=-1, keepdims=True)
        return d * jax.lax.rsqrt(var + EPS) * g_ref[...] + b_ref[...]

    def elu(h):
        # Clamp the exponent so the EUP never chews on large positives.
        return jnp.where(h > 0, h, jnp.exp(jnp.minimum(h, 0.0)) - 1.0)

    def kernel(x_ref, m_ref, g1_ref, b1_ref, w1_ref, g2_ref, b2_ref, w2_ref,
               g3_ref, b3_ref, w3_ref, o_ref):
        # --- InstanceNorm(C) -> ELU -> 1x1 conv (C -> NB), bf16 MXU / fp32 accumulation ---
        h = elu(inorm(x_ref[...].astype(jnp.float32), g1_ref, b1_ref))     # (C, HW)
        h = jnp.dot(w1_ref[...], h.astype(jnp.bfloat16),
                    preferred_element_type=jnp.float32)                    # (NB, HW)

        # --- InstanceNorm(NB) -> ELU -> KxK dilated "same" conv (NB -> NB) ---
        h = elu(inorm(h, g2_ref, b2_ref)).astype(jnp.bfloat16)             # (NB, HW) bf16

        acc = jnp.zeros((NB, HW), jnp.float32)
        for ky in range(K):
            for kx in range(K):
                t = ky * K + kx
                off = (ky * DIL - PAD) * W + (kx * DIL - PAD)
                # tap[s] = h[s + off] with zero fill: static lane-axis slices + concat.
                if off > 0:
                    sh = jnp.concatenate(
                        [h[:, off:], jnp.zeros((NB, off), h.dtype)], axis=-1)
                elif off < 0:
                    sh = jnp.concatenate(
                        [jnp.zeros((NB, -off), h.dtype), h[:, :off]], axis=-1)
                else:
                    sh = h
                if needs_mask[t]:
                    sh = sh * m_ref[t:t + 1, :]                            # (1, HW) bf16 mask
                # Feed the tap straight to the MXU; accumulate in fp32 registers.
                acc = acc + jnp.dot(w2_ref[t], sh,
                                    preferred_element_type=jnp.float32)    # (NB, HW)

        # --- InstanceNorm(NB) -> ELU -> Dropout(identity) -> 1x1 conv (NB -> C) ---
        h = elu(inorm(acc, g3_ref, b3_ref))
        # TODO(synk): Dropout(p=0.15) is identity (inference mode); training semantics would
        #             require a pltpu.prng_* mask.
        h = jnp.dot(w3_ref[...], h.astype(jnp.bfloat16),
                    preferred_element_type=jnp.float32)                    # (C, HW)

        # --- residual: re-read the input block (still resident in its VMEM buffer) so the
        #     fp32 x value is not kept live across the three matmul stages ---
        o_ref[...] = (x_ref[...].astype(jnp.float32) + h).astype(o_ref.dtype)

    return kernel


def _vmem_limit_bytes(H, W, C, NB, K):
    """Explicit scoped-VMEM limit from the per-step working set, capped per chip."""
    HW = H * W
    blk = C * HW * 4
    est = 4 * blk                               # in + out image blocks, double-buffered
    est += (3 * C + 8 * NB) * HW * 4            # fp32/bf16 intermediates (upper bound)
    est += 2 * (C * NB + K * K * NB * NB + NB * C) * 2 + K * K * HW * 2   # params + masks
    est += 2 << 20                              # slack
    try:
        cap = int(getattr(pltpu.get_tpu_info(), "vmem_capacity_bytes", 64 << 20))
    except Exception:  # pragma: no cover - conservative fallback if query unavailable
        cap = 64 << 20
    # Leave headroom: ~48 MiB usable on v7x (64 MiB VMEM), ~96 MiB on v5e/v6e (128 MiB).
    return int(min(max(est, 32 << 20), cap * 3 // 4))


def resblock2d_bottleneck(x_nchw, params, kernel_size=3, dilation=1):
    """x_nchw: (B, C, H, W) float32.  params: tuple of 9 arrays (see init_params)."""
    B, C, H, W = x_nchw.shape
    assert C % 2 == 0, "n_c must be even (bottleneck n_b = n_c // 2)"
    NB = C // 2
    K = kernel_size
    PAD = _same_padding(K, dilation)
    HW = H * W
    g1, b1, w1, g2, b2, w2, g3, b3, w3 = params

    # Lane-dense (C, H*W) orientation; NCHW -> (B, C, H*W) is a free reshape (no transpose).
    x2 = x_nchw.reshape(B, C, HW)

    # Matmul operands in (out, in) orientation and bf16 (MXU native); fp32 accumulation.
    w1t = jnp.transpose(w1).astype(jnp.bfloat16)                                    # (NB, C)
    w2t = jnp.transpose(w2, (0, 1, 3, 2)).reshape(K * K, NB, NB).astype(jnp.bfloat16)
    w3t = jnp.transpose(w3).astype(jnp.bfloat16)                                    # (C, NB)

    masks_np = _tap_masks(H, W, K, dilation, PAD)
    masks = jnp.asarray(masks_np, jnp.bfloat16)                                     # (K*K, HW)

    def rep(shape):
        n = len(shape)
        return pl.BlockSpec(shape, lambda b, _n=n: (0,) * _n)

    kern = _make_kernel(H, W, C, NB, K, dilation, PAD, masks_np)

    out2 = pl.pallas_call(
        kern,
        out_shape=jax.ShapeDtypeStruct((B, C, HW), x_nchw.dtype),
        grid=(B,),
        in_specs=[
            pl.BlockSpec((None, C, HW), lambda b: (b, 0, 0)),    # one image per step
            rep((K * K, HW)),
            rep((C, 1)), rep((C, 1)), rep((NB, C)),
            rep((NB, 1)), rep((NB, 1)), rep((K * K, NB, NB)),
            rep((NB, 1)), rep((NB, 1)), rep((C, NB)),
        ],
        out_specs=pl.BlockSpec((None, C, HW), lambda b: (b, 0, 0)),
        # No input/output aliasing: x2 may be a bitcast view of the caller's buffer.
        compiler_params=pltpu.CompilerParams(
            dimension_semantics=("parallel",),
            vmem_limit_bytes=_vmem_limit_bytes(H, W, C, NB, K)),
    )(
        x2, masks,
        g1.reshape(C, 1), b1.reshape(C, 1), w1t,
        g2.reshape(NB, 1), b2.reshape(NB, 1), w2t,
        g3.reshape(NB, 1), b3.reshape(NB, 1), w3t,
    )
    return out2.reshape(B, C, H, W)


def reference(x_nchw, params, kernel_size=3, dilation=1):
    """Pure-JAX fp32 reference (matches the PyTorch module in eval mode)."""
    g1, b1, w1, g2, b2, w2, g3, b3, w3 = params
    x = jnp.transpose(x_nchw, (0, 2, 3, 1))

    def inorm(h, g, b):
        mu = jnp.mean(h, axis=(1, 2), keepdims=True)
        var = jnp.mean((h - mu) ** 2, axis=(1, 2), keepdims=True)
        return (h - mu) / jnp.sqrt(var + EPS) * g + b

    elu = lambda h: jnp.where(h > 0, h, jnp.exp(h) - 1.0)
    dn = ("NHWC", "HWIO", "NHWC")
    pad = _same_padding(kernel_size, dilation)

    h = elu(inorm(x, g1, b1))
    h = jax.lax.conv_general_dilated(h, w1.reshape(1, 1, *w1.shape), (1, 1), "VALID",
                                     dimension_numbers=dn)
    h = elu(inorm(h, g2, b2))
    h = jax.lax.conv_general_dilated(h, w2, (1, 1), [(pad, pad), (pad, pad)],
                                     rhs_dilation=(dilation, dilation),
                                     dimension_numbers=dn)
    h = elu(inorm(h, g3, b3))
    h = jax.lax.conv_general_dilated(h, w3.reshape(1, 1, *w3.shape), (1, 1), "VALID",
                                     dimension_numbers=dn)
    return jnp.transpose(x + h, (0, 3, 1, 2))


def init_params(key, n_c, kernel_size=3):
    """Deterministic synthetic parameters (shapes match the PyTorch module)."""
    n_b = n_c // 2
    ks = jax.random.split(key, 6)
    g1 = 1.0 + 0.1 * jax.random.normal(ks[0], (n_c,), jnp.float32)
    b1 = 0.1 * jax.random.normal(ks[1], (n_c,), jnp.float32)
    g2 = 1.0 + 0.1 * jax.random.normal(ks[2], (n_b,), jnp.float32)
    b2 = 0.1 * jax.random.normal(ks[3], (n_b,), jnp.float32)
    g3 = 1.0 + 0.1 * jax.random.normal(ks[4], (n_b,), jnp.float32)
    b3 = 0.1 * jax.random.normal(ks[5], (n_b,), jnp.float32)
    kw = jax.random.split(jax.random.fold_in(key, 7), 3)
    # Stored as matmul-friendly layouts: (in, out) and (kH, kW, in, out).
    w1 = 0.2 * jax.random.normal(kw[0], (n_c, n_b), jnp.float32)
    w2 = 0.2 * jax.random.normal(kw[1], (kernel_size, kernel_size, n_b, n_b), jnp.float32)
    w3 = 0.2 * jax.random.normal(kw[2], (n_b, n_c), jnp.float32)
    return (g1, b1, w1, g2, b2, w2, g3, b3, w3)


if __name__ == "__main__":
    B, C, H, W = 2, 8, 16, 16          # n_c=8 -> bottleneck n_b=4
    kernel_size, dilation = 3, 1

    key = jax.random.PRNGKey(0)
    kx_, kp = jax.random.split(key)
    x = jax.random.normal(kx_, (B, C, H, W), jnp.float32)
    params = init_params(kp, C, kernel_size)

    fwd = jax.jit(functools.partial(resblock2d_bottleneck,
                                    kernel_size=kernel_size, dilation=dilation))
    out = jax.block_until_ready(fwd(x, params))

    ref = jax.block_until_ready(reference(x, params, kernel_size, dilation))
    assert out.shape == (B, C, H, W)
    # Kernel uses bf16 MXU operands with fp32 accumulation; reference is pure fp32,
    # so the tolerance reflects bf16 operand rounding (typical error ~1e-3).
    np.testing.assert_allclose(np.asarray(out), np.asarray(ref), rtol=2e-2, atol=2e-2)

    print("KERNEL_OK")
</pallas_src>

<mosaic_0001>
module attributes {stable_mosaic.version = 11 : i64} {
  func.func @kernel(%arg0: i32, %arg1: memref<1x8x256xf32, #tpu.memory_space<vmem>>, %arg2: memref<9x256xbf16, #tpu.memory_space<vmem>>, %arg3: memref<8x1xf32, #tpu.memory_space<vmem>>, %arg4: memref<8x1xf32, #tpu.memory_space<vmem>>, %arg5: memref<4x8xbf16, #tpu.memory_space<vmem>>, %arg6: memref<4x1xf32, #tpu.memory_space<vmem>>, %arg7: memref<4x1xf32, #tpu.memory_space<vmem>>, %arg8: memref<9x4x4xbf16, #tpu.memory_space<vmem>>, %arg9: memref<4x1xf32, #tpu.memory_space<vmem>>, %arg10: memref<4x1xf32, #tpu.memory_space<vmem>>, %arg11: memref<8x4xbf16, #tpu.memory_space<vmem>>, %arg12: memref<1x8x256xf32, #tpu.memory_space<vmem>>) attributes {dimension_semantics = [#tpu.dimension_semantics<parallel>], iteration_bounds = array<i64: 2>, scalar_prefetch = 0 : i64, scratch_operands = 0 : i64, tpu.core_type = #tpu.core_type<tc>, window_params = [{transform_indices = @transform_0, window_bounds = array<i64: 1, 8, 256>}, {pipeline_mode = #tpu.pipeline_mode<synchronous>, transform_indices = @transform_1, window_bounds = array<i64: 9, 256>}, {pipeline_mode = #tpu.pipeline_mode<synchronous>, transform_indices = @transform_2, window_bounds = array<i64: 8, 1>}, {pipeline_mode = #tpu.pipeline_mode<synchronous>, transform_indices = @transform_3, window_bounds = array<i64: 8, 1>}, {pipeline_mode = #tpu.pipeline_mode<synchronous>, transform_indices = @transform_4, window_bounds = array<i64: 4, 8>}, {pipeline_mode = #tpu.pipeline_mode<synchronous>, transform_indices = @transform_5, window_bounds = array<i64: 4, 1>}, {pipeline_mode = #tpu.pipeline_mode<synchronous>, transform_indices = @transform_6, window_bounds = array<i64: 4, 1>}, {pipeline_mode = #tpu.pipeline_mode<synchronous>, transform_indices = @transform_7, window_bounds = array<i64: 9, 4, 4>}, {pipeline_mode = #tpu.pipeline_mode<synchronous>, transform_indices = @transform_8, window_bounds = array<i64: 4, 1>}, {pipeline_mode = #tpu.pipeline_mode<synchronous>, transform_indices = @transform_9, window_bounds = array<i64: 4, 1>}, {pipeline_mode = #tpu.pipeline_mode<synchronous>, transform_indices = @transform_10, window_bounds = array<i64: 8, 4>}, {transform_indices = @transform_11, window_bounds = array<i64: 1, 8, 256>}]} {
    %c0 = arith.constant 0 : index
    %c0_0 = arith.constant 0 : index
    %c0_1 = arith.constant 0 : index
    %0 = vector.load %arg1[%c0, %c0_0, %c0_1] : memref<1x8x256xf32, #tpu.memory_space<vmem>>, vector<1x8x256xf32>
    %1 = vector.shape_cast %0 : vector<1x8x256xf32> to vector<8x256xf32>
    %cst = arith.constant dense<0.000000e+00> : vector<8xf32>
    %2 = vector.multi_reduction <add>, %1, %cst [1] : vector<8x256xf32> to vector<8xf32>
    %3 = vector.shape_cast %2 : vector<8xf32> to vector<8x1xf32>
    %cst_2 = arith.constant 2.560000e+02 : f32
    %4 = vector.broadcast %cst_2 : f32 to vector<8x1xf32>
    %5 = arith.divf %3, %4 : vector<8x1xf32>
    %6 = vector.broadcast %5 : vector<8x1xf32> to vector<8x256xf32>
    %7 = arith.subf %1, %6 : vector<8x256xf32>
    %8 = arith.mulf %7, %7 : vector<8x256xf32>
    %cst_3 = arith.constant dense<0.000000e+00> : vector<8xf32>
    %9 = vector.multi_reduction <add>, %8, %cst_3 [1] : vector<8x256xf32> to vector<8xf32>
    %10 = vector.shape_cast %9 : vector<8xf32> to vector<8x1xf32>
    %cst_4 = arith.constant 2.560000e+02 : f32
    %11 = vector.broadcast %cst_4 : f32 to vector<8x1xf32>
    %12 = arith.divf %10, %11 : vector<8x1xf32>
    %cst_5 = arith.constant 9.99999997E-7 : f32
    %13 = vector.broadcast %cst_5 : f32 to vector<8x1xf32>
    %14 = arith.addf %12, %13 : vector<8x1xf32>
    %15 = math.rsqrt %14 : vector<8x1xf32>
    %16 = vector.broadcast %15 : vector<8x1xf32> to vector<8x256xf32>
    %17 = arith.mulf %7, %16 : vector<8x256xf32>
    %c0_6 = arith.constant 0 : index
    %c0_7 = arith.constant 0 : index
    %18 = vector.load %arg3[%c0_6, %c0_7] : memref<8x1xf32, #tpu.memory_space<vmem>>, vector<8x1xf32>
    %19 = vector.broadcast %18 : vector<8x1xf32> to vector<8x256xf32>
    %20 = arith.mulf %17, %19 : vector<8x256xf32>
    %c0_8 = arith.constant 0 : index
    %c0_9 = arith.constant 0 : index
    %21 = vector.load %arg4[%c0_8, %c0_9] : memref<8x1xf32, #tpu.memory_space<vmem>>, vector<8x1xf32>
    %22 = vector.broadcast %21 : vector<8x1xf32> to vector<8x256xf32>
    %23 = arith.addf %20, %22 : vector<8x256xf32>
    %cst_10 = arith.constant 0.000000e+00 : f32
    %24 = vector.broadcast %cst_10 : f32 to vector<8x256xf32>
    %25 = arith.cmpf ogt, %23, %24 : vector<8x256xf32>
    %cst_11 = arith.constant 0.000000e+00 : f32
    %26 = vector.broadcast %cst_11 : f32 to vector<8x256xf32>
    %27 = arith.minimumf %23, %26 : vector<8x256xf32>
    %28 = math.exp %27 : vector<8x256xf32>
    %cst_12 = arith.constant 1.000000e+00 : f32
    %29 = vector.broadcast %cst_12 : f32 to vector<8x256xf32>
    %30 = arith.subf %28, %29 : vector<8x256xf32>
    %31 = arith.select %25, %23, %30 : vector<8x256xi1>, vector<8x256xf32>
    %c0_13 = arith.constant 0 : index
    %c0_14 = arith.constant 0 : index
    %32 = vector.load %arg5[%c0_13, %c0_14] : memref<4x8xbf16, #tpu.memory_space<vmem>>, vector<4x8xbf16>
    %33 = arith.truncf %31 : vector<8x256xf32> to vector<8x256xbf16>
    %cst_15 = arith.constant dense<0.000000e+00> : vector<4x256xf32>
    %34 = tpu.matmul %32, %33, %cst_15 {dimension_numbers = #tpu.dot_dimension_numbers<[1], [0], [0], [1], [0, 0, 1, 1], [], []>} : vector<4x8xbf16>, vector<8x256xbf16>, vector<4x256xf32> -> vector<4x256xf32>
    %cst_16 = arith.constant dense<0.000000e+00> : vector<4xf32>
    %35 = vector.multi_reduction <add>, %34, %cst_16 [1] : vector<4x256xf32> to vector<4xf32>
    %36 = vector.shape_cast %35 : vector<4xf32> to vector<4x1xf32>
    %cst_17 = arith.constant 2.560000e+02 : f32
    %37 = vector.broadcast %cst_17 : f32 to vector<4x1xf32>
    %38 = arith.divf %36, %37 : vector<4x1xf32>
    %39 = vector.broadcast %38 : vector<4x1xf32> to vector<4x256xf32>
    %40 = arith.subf %34, %39 : vector<4x256xf32>
    %41 = arith.mulf %40, %40 : vector<4x256xf32>
    %cst_18 = arith.constant dense<0.000000e+00> : vector<4xf32>
    %42 = vector.multi_reduction <add>, %41, %cst_18 [1] : vector<4x256xf32> to vector<4xf32>
    %43 = vector.shape_cast %42 : vector<4xf32> to vector<4x1xf32>
    %cst_19 = arith.constant 2.560000e+02 : f32
    %44 = vector.broadcast %cst_19 : f32 to vector<4x1xf32>
    %45 = arith.divf %43, %44 : vector<4x1xf32>
    %cst_20 = arith.constant 9.99999997E-7 : f32
    %46 = vector.broadcast %cst_20 : f32 to vector<4x1xf32>
    %47 = arith.addf %45, %46 : vector<4x1xf32>
    %48 = math.rsqrt %47 : vector<4x1xf32>
    %49 = vector.broadcast %48 : vector<4x1xf32> to vector<4x256xf32>
    %50 = arith.mulf %40, %49 : vector<4x256xf32>
    %c0_21 = arith.constant 0 : index
    %c0_22 = arith.constant 0 : index
    %51 = vector.load %arg6[%c0_21, %c0_22] : memref<4x1xf32, #tpu.memory_space<vmem>>, vector<4x1xf32>
    %52 = vector.broadcast %51 : vector<4x1xf32> to vector<4x256xf32>
    %53 = arith.mulf %50, %52 : vector<4x256xf32>
    %c0_23 = arith.constant 0 : index
    %c0_24 = arith.constant 0 : index
    %54 = vector.load %arg7[%c0_23, %c0_24] : memref<4x1xf32, #tpu.memory_space<vmem>>, vector<4x1xf32>
    %55 = vector.broadcast %54 : vector<4x1xf32> to vector<4x256xf32>
    %56 = arith.addf %53, %55 : vector<4x256xf32>
    %cst_25 = arith.constant 0.000000e+00 : f32
    %57 = vector.broadcast %cst_25 : f32 to vector<4x256xf32>
    %58 = arith.cmpf ogt, %56, %57 : vector<4x256xf32>
    %cst_26 = arith.constant 0.000000e+00 : f32
    %59 = vector.broadcast %cst_26 : f32 to vector<4x256xf32>
    %60 = arith.minimumf %56, %59 : vector<4x256xf32>
    %61 = math.exp %60 : vector<4x256xf32>
    %cst_27 = arith.constant 1.000000e+00 : f32
    %62 = vector.broadcast %cst_27 : f32 to vector<4x256xf32>
    %63 = arith.subf %61, %62 : vector<4x256xf32>
    %64 = arith.select %58, %56, %63 : vector<4x256xi1>, vector<4x256xf32>
    %65 = arith.truncf %64 : vector<4x256xf32> to vector<4x256xbf16>
    %cst_28 = arith.constant 0.000000e+00 : f32
    %66 = vector.broadcast %cst_28 : f32 to vector<4x256xf32>
    %cst_29 = arith.constant 0.000000e+00 : bf16
    %67 = vector.broadcast %cst_29 : bf16 to vector<4x17xbf16>
    %68 = vector.extract_strided_slice %65 {offsets = [0, 0], sizes = [4, 239], strides = [1, 1]} : vector<4x256xbf16> to vector<4x239xbf16>
    %69 = tpu.concatenate %67, %68 in 1 : vector<4x17xbf16>, vector<4x239xbf16> -> vector<4x256xbf16>
    %c0_30 = arith.constant 0 : index
    %c0_31 = arith.constant 0 : index
    %70 = vector.load %arg2[%c0_30, %c0_31] : memref<9x256xbf16, #tpu.memory_space<vmem>>, vector<1x256xbf16>
    %71 = vector.broadcast %70 : vector<1x256xbf16> to vector<4x256xbf16>
    %72 = arith.mulf %69, %71 : vector<4x256xbf16>
    %c0_32 = arith.constant 0 : index
    %c0_33 = arith.constant 0 : index
    %c0_34 = arith.constant 0 : index
    %73 = vector.load %arg8[%c0_32, %c0_33, %c0_34] : memref<9x4x4xbf16, #tpu.memory_space<vmem>>, vector<1x4x4xbf16>
    %74 = vector.shape_cast %73 : vector<1x4x4xbf16> to vector<4x4xbf16>
    %cst_35 = arith.constant dense<0.000000e+00> : vector<4x256xf32>
    %75 = tpu.matmul %74, %72, %cst_35 {dimension_numbers = #tpu.dot_dimension_numbers<[1], [0], [0], [1], [0, 0, 1, 1], [], []>} : vector<4x4xbf16>, vector<4x256xbf16>, vector<4x256xf32> -> vector<4x256xf32>
    %76 = arith.addf %66, %75 : vector<4x256xf32>
    %cst_36 = arith.constant 0.000000e+00 : bf16
    %77 = vector.broadcast %cst_36 : bf16 to vector<4x16xbf16>
    %78 = vector.extract_strided_slice %65 {offsets = [0, 0], sizes = [4, 240], strides = [1, 1]} : vector<4x256xbf16> to vector<4x240xbf16>
    %79 = tpu.concatenate %77, %78 in 1 : vector<4x16xbf16>, vector<4x240xbf16> -> vector<4x256xbf16>
    %c1 = arith.constant 1 : index
    %c0_37 = arith.constant 0 : index
    %80 = vector.load %arg2[%c1, %c0_37] : memref<9x256xbf16, #tpu.memory_space<vmem>>, vector<1x256xbf16>
    %81 = vector.broadcast %80 : vector<1x256xbf16> to vector<4x256xbf16>
    %82 = arith.mulf %79, %81 : vector<4x256xbf16>
    %c1_38 = arith.constant 1 : index
    %c0_39 = arith.constant 0 : index
    %c0_40 = arith.constant 0 : index
    %83 = vector.load %arg8[%c1_38, %c0_39, %c0_40] : memref<9x4x4xbf16, #tpu.memory_space<vmem>>, vector<1x4x4xbf16>
    %84 = vector.shape_cast %83 : vector<1x4x4xbf16> to vector<4x4xbf16>
    %cst_41 = arith.constant dense<0.000000e+00> : vector<4x256xf32>
    %85 = tpu.matmul %84, %82, %cst_41 {dimension_numbers = #tpu.dot_dimension_numbers<[1], [0], [0], [1], [0, 0, 1, 1], [], []>} : vector<4x4xbf16>, vector<4x256xbf16>, vector<4x256xf32> -> vector<4x256xf32>
    %86 = arith.addf %76, %85 : vector<4x256xf32>
    %cst_42 = arith.constant 0.000000e+00 : bf16
    %87 = vector.broadcast %cst_42 : bf16 to vector<4x15xbf16>
    %88 = vector.extract_strided_slice %65 {offsets = [0, 0], sizes = [4, 241], strides = [1, 1]} : vector<4x256xbf16> to vector<4x241xbf16>
    %89 = tpu.concatenate %87, %88 in 1 : vector<4x15xbf16>, vector<4x241xbf16> -> vector<4x256xbf16>
    %c2 = arith.constant 2 : index
    %c0_43 = arith.constant 0 : index
    %90 = vector.load %arg2[%c2, %c0_43] : memref<9x256xbf16, #tpu.memory_space<vmem>>, vector<1x256xbf16>
    %91 = vector.broadcast %90 : vector<1x256xbf16> to vector<4x256xbf16>
    %92 = arith.mulf %89, %91 : vector<4x256xbf16>
    %c2_44 = arith.constant 2 : index
    %c0_45 = arith.constant 0 : index
    %c0_46 = arith.constant 0 : index
    %93 = vector.load %arg8[%c2_44, %c0_45, %c0_46] : memref<9x4x4xbf16, #tpu.memory_space<vmem>>, vector<1x4x4xbf16>
    %94 = vector.shape_cast %93 : vector<1x4x4xbf16> to vector<4x4xbf16>
    %cst_47 = arith.constant dense<0.000000e+00> : vector<4x256xf32>
    %95 = tpu.matmul %94, %92, %cst_47 {dimension_numbers = #tpu.dot_dimension_numbers<[1], [0], [0], [1], [0, 0, 1, 1], [], []>} : vector<4x4xbf16>, vector<4x256xbf16>, vector<4x256xf32> -> vector<4x256xf32>
    %96 = arith.addf %86, %95 : vector<4x256xf32>
    %cst_48 = arith.constant 0.000000e+00 : bf16
    %97 = vector.broadcast %cst_48 : bf16 to vector<4x1xbf16>
    %98 = vector.extract_strided_slice %65 {offsets = [0, 0], sizes = [4, 255], strides = [1, 1]} : vector<4x256xbf16> to vector<4x255xbf16>
    %99 = tpu.concatenate %97, %98 in 1 : vector<4x1xbf16>, vector<4x255xbf16> -> vector<4x256xbf16>
    %c3 = arith.constant 3 : index
    %c0_49 = arith.constant 0 : index
    %100 = vector.load %arg2[%c3, %c0_49] : memref<9x256xbf16, #tpu.memory_space<vmem>>, vector<1x256xbf16>
    %101 = vector.broadcast %100 : vector<1x256xbf16> to vector<4x256xbf16>
    %102 = arith.mulf %99, %101 : vector<4x256xbf16>
    %c3_50 = arith.constant 3 : index
    %c0_51 = arith.constant 0 : index
    %c0_52 = arith.constant 0 : index
    %103 = vector.load %arg8[%c3_50, %c0_51, %c0_52] : memref<9x4x4xbf16, #tpu.memory_space<vmem>>, vector<1x4x4xbf16>
    %104 = vector.shape_cast %103 : vector<1x4x4xbf16> to vector<4x4xbf16>
    %cst_53 = arith.constant dense<0.000000e+00> : vector<4x256xf32>
    %105 = tpu.matmul %104, %102, %cst_53 {dimension_numbers = #tpu.dot_dimension_numbers<[1], [0], [0], [1], [0, 0, 1, 1], [], []>} : vector<4x4xbf16>, vector<4x256xbf16>, vector<4x256xf32> -> vector<4x256xf32>
    %106 = arith.addf %96, %105 : vector<4x256xf32>
    %c4 = arith.constant 4 : index
    %c0_54 = arith.constant 0 : index
    %c0_55 = arith.constant 0 : index
    %107 = vector.load %arg8[%c4, %c0_54, %c0_55] : memref<9x4x4xbf16, #tpu.memory_space<vmem>>, vector<1x4x4xbf16>
    %108 = vector.shape_cast %107 : vector<1x4x4xbf16> to vector<4x4xbf16>
    %cst_56 = arith.constant dense<0.000000e+00> : vector<4x256xf32>
    %109 = tpu.matmul %108, %65, %cst_56 {dimension_numbers = #tpu.dot_dimension_numbers<[1], [0], [0], [1], [0, 0, 1, 1], [], []>} : vector<4x4xbf16>, vector<4x256xbf16>, vector<4x256xf32> -> vector<4x256xf32>
    %110 = arith.addf %106, %109 : vector<4x256xf32>
    %111 = vector.extract_strided_slice %65 {offsets = [0, 1], sizes = [4, 255], strides = [1, 1]} : vector<4x256xbf16> to vector<4x255xbf16>
    %cst_57 = arith.constant 0.000000e+00 : bf16
    %112 = vector.broadcast %cst_57 : bf16 to vector<4x1xbf16>
    %113 = tpu.concatenate %111, %112 in 1 : vector<4x255xbf16>, vector<4x1xbf16> -> vector<4x256xbf16>
    %c5 = arith.constant 5 : index
    %c0_58 = arith.constant 0 : index
    %114 = vector.load %arg2[%c5, %c0_58] : memref<9x256xbf16, #tpu.memory_space<vmem>>, vector<1x256xbf16>
    %115 = vector.broadcast %114 : vector<1x256xbf16> to vector<4x256xbf16>
    %116 = arith.mulf %113, %115 : vector<4x256xbf16>
    %c5_59 = arith.constant 5 : index
    %c0_60 = arith.constant 0 : index
    %c0_61 = arith.constant 0 : index
    %117 = vector.load %arg8[%c5_59, %c0_60, %c0_61] : memref<9x4x4xbf16, #tpu.memory_space<vmem>>, vector<1x4x4xbf16>
    %118 = vector.shape_cast %117 : vector<1x4x4xbf16> to vector<4x4xbf16>
    %cst_62 = arith.constant dense<0.000000e+00> : vector<4x256xf32>
    %119 = tpu.matmul %118, %116, %cst_62 {dimension_numbers = #tpu.dot_dimension_numbers<[1], [0], [0], [1], [0, 0, 1, 1], [], []>} : vector<4x4xbf16>, vector<4x256xbf16>, vector<4x256xf32> -> vector<4x256xf32>
    %120 = arith.addf %110, %119 : vector<4x256xf32>
    %121 = vector.extract_strided_slice %65 {offsets = [0, 15], sizes = [4, 241], strides = [1, 1]} : vector<4x256xbf16> to vector<4x241xbf16>
    %cst_63 = arith.constant 0.000000e+00 : bf16
    %122 = vector.broadcast %cst_63 : bf16 to vector<4x15xbf16>
    %123 = tpu.concatenate %121, %122 in 1 : vector<4x241xbf16>, vector<4x15xbf16> -> vector<4x256xbf16>
    %c6 = arith.constant 6 : index
    %c0_64 = arith.constant 0 : index
    %124 = vector.load %arg2[%c6, %c0_64] : memref<9x256xbf16, #tpu.memory_space<vmem>>, vector<1x256xbf16>
    %125 = vector.broadcast %124 : vector<1x256xbf16> to vector<4x256xbf16>
    %126 = arith.mulf %123, %125 : vector<4x256xbf16>
    %c6_65 = arith.constant 6 : index
    %c0_66 = arith.constant 0 : index
    %c0_67 = arith.constant 0 : index
    %127 = vector.load %arg8[%c6_65, %c0_66, %c0_67] : memref<9x4x4xbf16, #tpu.memory_space<vmem>>, vector<1x4x4xbf16>
    %128 = vector.shape_cast %127 : vector<1x4x4xbf16> to vector<4x4xbf16>
    %cst_68 = arith.constant dense<0.000000e+00> : vector<4x256xf32>
    %129 = tpu.matmul %128, %126, %cst_68 {dimension_numbers = #tpu.dot_dimension_numbers<[1], [0], [0], [1], [0, 0, 1, 1], [], []>} : vector<4x4xbf16>, vector<4x256xbf16>, vector<4x256xf32> -> vector<4x256xf32>
    %130 = arith.addf %120, %129 : vector<4x256xf32>
    %131 = vector.extract_strided_slice %65 {offsets = [0, 16], sizes = [4, 240], strides = [1, 1]} : vector<4x256xbf16> to vector<4x240xbf16>
    %cst_69 = arith.constant 0.000000e+00 : bf16
    %132 = vector.broadcast %cst_69 : bf16 to vector<4x16xbf16>
    %133 = tpu.concatenate %131, %132 in 1 : vector<4x240xbf16>, vector<4x16xbf16> -> vector<4x256xbf16>
    %c7 = arith.constant 7 : index
    %c0_70 = arith.constant 0 : index
    %134 = vector.load %arg2[%c7, %c0_70] : memref<9x256xbf16, #tpu.memory_space<vmem>>, vector<1x256xbf16>
    %135 = vector.broadcast %134 : vector<1x256xbf16> to vector<4x256xbf16>
    %136 = arith.mulf %133, %135 : vector<4x256xbf16>
    %c7_71 = arith.constant 7 : index
    %c0_72 = arith.constant 0 : index
    %c0_73 = arith.constant 0 : index
    %137 = vector.load %arg8[%c7_71, %c0_72, %c0_73] : memref<9x4x4xbf16, #tpu.memory_space<vmem>>, vector<1x4x4xbf16>
    %138 = vector.shape_cast %137 : vector<1x4x4xbf16> to vector<4x4xbf16>
    %cst_74 = arith.constant dense<0.000000e+00> : vector<4x256xf32>
    %139 = tpu.matmul %138, %136, %cst_74 {dimension_numbers = #tpu.dot_dimension_numbers<[1], [0], [0], [1], [0, 0, 1, 1], [], []>} : vector<4x4xbf16>, vector<4x256xbf16>, vector<4x256xf32> -> vector<4x256xf32>
    %140 = arith.addf %130, %139 : vector<4x256xf32>
    %141 = vector.extract_strided_slice %65 {offsets = [0, 17], sizes = [4, 239], strides = [1, 1]} : vector<4x256xbf16> to vector<4x239xbf16>
    %cst_75 = arith.constant 0.000000e+00 : bf16
    %142 = vector.broadcast %cst_75 : bf16 to vector<4x17xbf16>
    %143 = tpu.concatenate %141, %142 in 1 : vector<4x239xbf16>, vector<4x17xbf16> -> vector<4x256xbf16>
    %c8 = arith.constant 8 : index
    %c0_76 = arith.constant 0 : index
    %144 = vector.load %arg2[%c8, %c0_76] : memref<9x256xbf16, #tpu.memory_space<vmem>>, vector<1x256xbf16>
    %145 = vector.broadcast %144 : vector<1x256xbf16> to vector<4x256xbf16>
    %146 = arith.mulf %143, %145 : vector<4x256xbf16>
    %c8_77 = arith.constant 8 : index
    %c0_78 = arith.constant 0 : index
    %c0_79 = arith.constant 0 : index
    %147 = vector.load %arg8[%c8_77, %c0_78, %c0_79] : memref<9x4x4xbf16, #tpu.memory_space<vmem>>, vector<1x4x4xbf16>
    %148 = vector.shape_cast %147 : vector<1x4x4xbf16> to vector<4x4xbf16>
    %cst_80 = arith.constant dense<0.000000e+00> : vector<4x256xf32>
    %149 = tpu.matmul %148, %146, %cst_80 {dimension_numbers = #tpu.dot_dimension_numbers<[1], [0], [0], [1], [0, 0, 1, 1], [], []>} : vector<4x4xbf16>, vector<4x256xbf16>, vector<4x256xf32> -> vector<4x256xf32>
    %150 = arith.addf %140, %149 : vector<4x256xf32>
    %cst_81 = arith.constant dense<0.000000e+00> : vector<4xf32>
    %151 = vector.multi_reduction <add>, %150, %cst_81 [1] : vector<4x256xf32> to vector<4xf32>
    %152 = vector.shape_cast %151 : vector<4xf32> to vector<4x1xf32>
    %cst_82 = arith.constant 2.560000e+02 : f32
    %153 = vector.broadcast %cst_82 : f32 to vector<4x1xf32>
    %154 = arith.divf %152, %153 : vector<4x1xf32>
    %155 = vector.broadcast %154 : vector<4x1xf32> to vector<4x256xf32>
    %156 = arith.subf %150, %155 : vector<4x256xf32>
    %157 = arith.mulf %156, %156 : vector<4x256xf32>
    %cst_83 = arith.constant dense<0.000000e+00> : vector<4xf32>
    %158 = vector.multi_reduction <add>, %157, %cst_83 [1] : vector<4x256xf32> to vector<4xf32>
    %159 = vector.shape_cast %158 : vector<4xf32> to vector<4x1xf32>
    %cst_84 = arith.constant 2.560000e+02 : f32
    %160 = vector.broadcast %cst_84 : f32 to vector<4x1xf32>
    %161 = arith.divf %159, %160 : vector<4x1xf32>
    %cst_85 = arith.constant 9.99999997E-7 : f32
    %162 = vector.broadcast %cst_85 : f32 to vector<4x1xf32>
    %163 = arith.addf %161, %162 : vector<4x1xf32>
    %164 = math.rsqrt %163 : vector<4x1xf32>
    %165 = vector.broadcast %164 : vector<4x1xf32> to vector<4x256xf32>
    %166 = arith.mulf %156, %165 : vector<4x256xf32>
    %c0_86 = arith.constant 0 : index
    %c0_87 = arith.constant 0 : index
    %167 = vector.load %arg9[%c0_86, %c0_87] : memref<4x1xf32, #tpu.memory_space<vmem>>, vector<4x1xf32>
    %168 = vector.broadcast %167 : vector<4x1xf32> to vector<4x256xf32>
    %169 = arith.mulf %166, %168 : vector<4x256xf32>
    %c0_88 = arith.constant 0 : index
    %c0_89 = arith.constant 0 : index
    %170 = vector.load %arg10[%c0_88, %c0_89] : memref<4x1xf32, #tpu.memory_space<vmem>>, vector<4x1xf32>
    %171 = vector.broadcast %170 : vector<4x1xf32> to vector<4x256xf32>
    %172 = arith.addf %169, %171 : vector<4x256xf32>
    %cst_90 = arith.constant 0.000000e+00 : f32
    %173 = vector.broadcast %cst_90 : f32 to vector<4x256xf32>
    %174 = arith.cmpf ogt, %172, %173 : vector<4x256xf32>
    %cst_91 = arith.constant 0.000000e+00 : f32
    %175 = vector.broadcast %cst_91 : f32 to vector<4x256xf32>
    %176 = arith.minimumf %172, %175 : vector<4x256xf32>
    %177 = math.exp %176 : vector<4x256xf32>
    %cst_92 = arith.constant 1.000000e+00 : f32
    %178 = vector.broadcast %cst_92 : f32 to vector<4x256xf32>
    %179 = arith.subf %177, %178 : vector<4x256xf32>
    %180 = arith.select %174, %172, %179 : vector<4x256xi1>, vector<4x256xf32>
    %c0_93 = arith.constant 0 : index
    %c0_94 = arith.constant 0 : index
    %181 = vector.load %arg11[%c0_93, %c0_94] : memref<8x4xbf16, #tpu.memory_space<vmem>>, vector<8x4xbf16>
    %182 = arith.truncf %180 : vector<4x256xf32> to vector<4x256xbf16>
    %cst_95 = arith.constant dense<0.000000e+00> : vector<8x256xf32>
    %183 = tpu.matmul %181, %182, %cst_95 {dimension_numbers = #tpu.dot_dimension_numbers<[1], [0], [0], [1], [0, 0, 1, 1], [], []>} : vector<8x4xbf16>, vector<4x256xbf16>, vector<8x256xf32> -> vector<8x256xf32>
    %c0_96 = arith.constant 0 : index
    %c0_97 = arith.constant 0 : index
    %c0_98 = arith.constant 0 : index
    %184 = vector.load %arg1[%c0_96, %c0_97, %c0_98] : memref<1x8x256xf32, #tpu.memory_space<vmem>>, vector<1x8x256xf32>
    %185 = vector.shape_cast %184 : vector<1x8x256xf32> to vector<8x256xf32>
    %186 = arith.addf %185, %183 : vector<8x256xf32>
    %c0_99 = arith.constant 0 : index
    %c0_100 = arith.constant 0 : index
    %c0_101 = arith.constant 0 : index
    %187 = vector.load %arg12[%c0_99, %c0_100, %c0_101] : memref<1x8x256xf32, #tpu.memory_space<vmem>>, vector<1x8x256xf32>
    %188 = vector.shape_cast %187 : vector<1x8x256xf32> to vector<8x256xf32>
    %189 = vector.shape_cast %186 : vector<8x256xf32> to vector<1x8x256xf32>
    tpu.vector_store %arg12[%c0_99, %c0_100, %c0_101], %189 {strides = array<i32>} : memref<1x8x256xf32, #tpu.memory_space<vmem>>, vector<1x8x256xf32>,
    return
  }
  func.func @transform_0(%arg0: i32) -> (i32, i32, i32) {
    %c0_i32 = arith.constant 0 : i32
    %c0_i32_0 = arith.constant 0 : i32
    %c0_i32_1 = arith.constant 0 : i32
    return %arg0, %c0_i32, %c0_i32_0 : i32, i32, i32
  }
  func.func @transform_1(%arg0: i32) -> (i32, i32) {
    %c0_i32 = arith.constant 0 : i32
    %c0_i32_0 = arith.constant 0 : i32
    %c0_i32_1 = arith.constant 0 : i32
    return %c0_i32, %c0_i32_0 : i32, i32
  }
  func.func @transform_2(%arg0: i32) -> (i32, i32) {
    %c0_i32 = arith.constant 0 : i32
    %c0_i32_0 = arith.constant 0 : i32
    %c0_i32_1 = arith.constant 0 : i32
    return %c0_i32, %c0_i32_0 : i32, i32
  }
  func.func @transform_3(%arg0: i32) -> (i32, i32) {
    %c0_i32 = arith.constant 0 : i32
    %c0_i32_0 = arith.constant 0 : i32
    %c0_i32_1 = arith.constant 0 : i32
    return %c0_i32, %c0_i32_0 : i32, i32
  }
  func.func @transform_4(%arg0: i32) -> (i32, i32) {
    %c0_i32 = arith.constant 0 : i32
    %c0_i32_0 = arith.constant 0 : i32
    %c0_i32_1 = arith.constant 0 : i32
    return %c0_i32, %c0_i32_0 : i32, i32
  }
  func.func @transform_5(%arg0: i32) -> (i32, i32) {
    %c0_i32 = arith.constant 0 : i32
    %c0_i32_0 = arith.constant 0 : i32
    %c0_i32_1 = arith.constant 0 : i32
    return %c0_i32, %c0_i32_0 : i32, i32
  }
  func.func @transform_6(%arg0: i32) -> (i32, i32) {
    %c0_i32 = arith.constant 0 : i32
    %c0_i32_0 = arith.constant 0 : i32
    %c0_i32_1 = arith.constant 0 : i32
    return %c0_i32, %c0_i32_0 : i32, i32
  }
  func.func @transform_7(%arg0: i32) -> (i32, i32, i32) {
    %c0_i32 = arith.constant 0 : i32
    %c0_i32_0 = arith.constant 0 : i32
    %c0_i32_1 = arith.constant 0 : i32
    %c0_i32_2 = arith.constant 0 : i32
    return %c0_i32, %c0_i32_0, %c0_i32_1 : i32, i32, i32
  }
  func.func @transform_8(%arg0: i32) -> (i32, i32) {
    %c0_i32 = arith.constant 0 : i32
    %c0_i32_0 = arith.constant 0 : i32
    %c0_i32_1 = arith.constant 0 : i32
    return %c0_i32, %c0_i32_0 : i32, i32
  }
  func.func @transform_9(%arg0: i32) -> (i32, i32) {
    %c0_i32 = arith.constant 0 : i32
    %c0_i32_0 = arith.constant 0 : i32
    %c0_i32_1 = arith.constant 0 : i32
    return %c0_i32, %c0_i32_0 : i32, i32
  }
  func.func @transform_10(%arg0: i32) -> (i32, i32) {
    %c0_i32 = arith.constant 0 : i32
    %c0_i32_0 = arith.constant 0 : i32
    %c0_i32_1 = arith.constant 0 : i32
    return %c0_i32, %c0_i32_0 : i32, i32
  }
  func.func @transform_11(%arg0: i32) -> (i32, i32, i32) {
    %c0_i32 = arith.constant 0 : i32
    %c0_i32_0 = arith.constant 0 : i32
    %c0_i32_1 = arith.constant 0 : i32
    return %arg0, %c0_i32, %c0_i32_0 : i32, i32, i32
  }
}

</mosaic_0001>

<bundles_post_ra>
// kernel: resblock2d_bottleneck.1
= control target key start
LH: loop header
LB: loop body
LE: loop exit
PB: predicated region body
PF: predicated region fallthrough
CT: control target
= control target key end

     0   :  { %s1617_s17 = smov 0   ;;  %s1830_s0 = inlined_call_operand.vmem [shape: f32[2,8,256], index: 0, kind: input, shape index: {}]   ;;  %s1831_s1 = inlined_call_operand.vmem [shape: bf16[9,256], index: 1, kind: input, shape index: {}]   ;;  %s1832_s2 = inlined_call_operand.vmem [shape: f32[8,1], index: 2, kind: input, shape index: {}]   ;;  %s1833_s3 = inlined_call_operand.vmem [shape: f32[8,1], index: 3, kind: input, shape index: {}]   ;;  %s1834_s4 = inlined_call_operand.vmem [shape: bf16[4,8], index: 4, kind: input, shape index: {}]   ;;  %s1835_s5 = inlined_call_operand.vmem [shape: f32[4,1], index: 5, kind: input, shape index: {}]   ;;  %s1836_s6 = inlined_call_operand.vmem [shape: f32[4,1], index: 6, kind: input, shape index: {}]   ;;  %s1837_s7 = inlined_call_operand.vmem [shape: bf16[9,4,4], index: 7, kind: input, shape index: {}]   ;;  %s1838_s8 = inlined_call_operand.vmem [shape: f32[4,1], index: 8, kind: input, shape index: {}]   ;;  %s1839_s9 = inlined_call_operand.vmem [shape: f32[4,1], index: 9, kind: input, shape index: {}]   ;;  %s1840_s10 = inlined_call_operand.vmem [shape: bf16[8,4], index: 10, kind: input, shape index: {}]   ;;  %s1841_s11 = inlined_call_operand.vmem [shape: f32[2,8,256], index: 11, kind: output, shape index: {}]  }
   0x1 LB: > { %s1434_s18 = sadd.s32 4294967295, %s1546_s17   ;;  %p1438_p0 = scmp.ge.s32.totalorder %s1546_s17, 1  ;;  %s1546_s17 = sphi %s1617_s17, %s21_s17  }
   0x2   : > { %p337_p1 = scmp.lt.s32.totalorder %s1546_s17, 3 }
   0x4   : > { %p338_p2 = pnand %p1438_p0, %p337_p1 }
   0x5   : > { %p377_p3 = scmp.lt.s32.totalorder (!%p338_p2), %s1434_s18, 1  ;;  %s1549_s14 = smov (!%p338_p2), 17  }
   0x6   : > { %341 = sbr.rel (%p338_p2) target bundleno = 1777 (0x6f1), region = 64  ;;  %s1550_s15 = smov (!%p338_p2), 16  }
   0x7   : > { %s1551_s16 = smov (!%p338_p2), 15   ;;  %s1552_s20 = smov (!%p338_p2), 1  }
   0x8   : > { %s1553_s21 = smov (!%p338_p2), 127   ;;  %s1555_s23 = smov (!%p338_p2), 112  }
   0x9   : > { %s1556_s24 = smov (!%p338_p2), 111  }
   0xb   : > { %s1843_s18 = smov (!%p377_p3, %s1434_s18), 1  ;;  %v407_v3 = vld [vmem:[%s1832_s2] sm:$0xff]  ;;  %v1548_v4 = vmov 0   ;;  %vm442_vm2 = vcmask 1043456   ;;  %vm438_vm3 = vcmask 64512   ;;  %vm581_vm6 = vcmask 130048  }
   0xc   : > { %s1491_s19 = sshll.u32 %s1843_s18, 4  ;;  %1510 = vset.pattern.permute.xlu1 %v1548_v4  ;;  %481 = vmatprep.mubr.bf16.mxu0 %v1548_v4  ;;  %v415_v5 = vld [vmem:[%s1833_s3] sm:$0xff]  ;;  %vm546_vm7 = vcmask 138240   ;;  %vm712_vm8 = vcmask 121856   ;;  %vm610_vm9 = vcmask 1041408   ;;  %vm799_vm10 = vcmask 7168  }
   0xd   : > { %s381_s22 = scalar_lea.vmem %s1830_s0, %s1491_s19  ;;  %410 = vperm.xlu1 %1510, %v407_v3   ;;  %1511 = vset.pattern.permute.xlu0 %v1548_v4  ;;  %v435_v38 = vld [vmem:[%s1834_s4] sm:$0x3]  ;;  %vm606_vm11 = vcmask 31744   ;;  %vm934_vm12 = vcmask 1039360   ;;  %vm1023_vm13 = vcmask 924672   ;;  %vm1110_vm14 = vcmask 916480   ;;  %s386_s29 = scalar_lea.vmem %s1841_s11, %s1491_s19 }
   0xe   : > { %v1633_v0 = vld [vmem:[%s381_s22] sm:$0xff]  ;;  %v1635_v1 = vld [vmem:[%s381_s22 + $0x8] sm:$0xff]  ;;  %649 = vmatprep.mubr.bf16.mxu1 %v1548_v4  ;;  %s1554_s22 = smov 113   ;;  %vm1191_vm15 = vcmask 908288  }
   0xf   : > { %v390_v2 = vadd.f32 %v1635_v1, %v1633_v0  ;;  %v510_v46 = vld [vmem:[%s1835_s5] sm:$0xf] }
  0x10   : > { %v518_v56 = vld [vmem:[%s1836_s6] sm:$0xf] }
  0x11   : > { %391 = vadd.xlane.f32.xlu0 %v390_v2  ;;  %418 = vperm.xlu1 %1510, %v415_v5  }
  0x88   : > { %v411_v16 = vpop.permute.xlu1 %410 }
  0x8c   : > { %v419_v22 = vpop.permute.xlu1 %418 }
  0x9a   : > { %v392_v6 = vpop.xlane.xlu0 %391 }
  0x9b   : > { %v394_v7 = vmul.f32 0.00390625, %v392_v6 }
  0x9d   : > { %v395_v8 = vsub.f32 %v1633_v0, %v394_v7  ;;  %v396_v9 = vsub.f32 %v1635_v1, %v394_v7 }
  0x9f   : > { %v397_v10 = vmul.f32 %v395_v8, %v395_v8  ;;  %v398_v11 = vmul.f32 %v396_v9, %v396_v9 }
  0xa1   : > { %v399_v12 = vadd.f32 %v398_v11, %v397_v10 }
  0xa3   : > { %400 = vadd.xlane.f32.xlu0 %v399_v12 }
 0x12c   : > { %v401_v13 = vpop.xlane.xlu0 %400 }
 0x12d   : > { %v402_v14 = vmul.f32 0.00390625, %v401_v13 }
 0x12f   : > { %v403_v15 = vadd.f32 1e-06, %v402_v14 }
 0x131   : > { %1522 = vrsqrt.f32 %v403_v15 }
 0x13e   : > { %v1523_v17 = vpop.eup %1522 }
 0x13f   : > { %v405_v18 = vmul.f32 %v1523_v17, %v395_v8  ;;  %v406_v19 = vmul.f32 %v1523_v17, %v396_v9 }
 0x141   : > { %v413_v20 = vmul.f32 %v411_v16, %v405_v18  ;;  %v414_v21 = vmul.f32 %v411_v16, %v406_v19 }
 0x143   : > { %v421_v23 = vadd.f32 %v419_v22, %v413_v20  ;;  %v422_v24 = vadd.f32 %v419_v22, %v414_v21  ;;  %v554_v20 = vld [vmem:[%s1831_s1] sm:$0x11]  ;;  %v563_v22 = vlaneseq }
 0x144   : > { %v1449_v21 = vcombine.low %v554_v20, %v554_v20 }
 0x145   : > { %v425_v25 = vmin.f32 %v421_v23, 0.0  ;;  %v426_v26 = vmin.f32 %v422_v24, 0.0  ;;  %vm423_vm0 = vcmp.gt.f32.partialorder %v421_v23, 0.0  ;;  %vm424_vm1 = vcmp.gt.f32.partialorder %v422_v24, 0.0 }
 0x147   : > { %v427_v27 = vmul.f32 1.442695, %v425_v25  ;;  %v429_v28 = vmul.f32 1.442695, %v426_v26  ;;  %v588_v25 = vshrl.u32 %v1449_v21, 16 }
 0x149   : > { %1524 = vpow2.f32 %v427_v27 }
 0x14a   : > { %1526 = vpow2.f32 %v429_v28  ;;  %v719_v28 = vld [vmem:[%s1831_s1] sm:$0x22] }
 0x156   : > { %v1525_v29 = vpop.eup %1524 }
 0x157   : > { %v1527_v30 = vpop.eup %1526  ;;  %v1443_v31 = vadd.f32 -1.0, %v1525_v29  ;;  %v589_v29 = vpack.i.b16 %v588_v25, %v588_v25 }
 0x158   : > { %v1444_v32 = vadd.f32 -1.0, %v1527_v30 }
 0x159   : > { %v433_v33 = vsel %vm423_vm0, %v421_v23, %v1443_v31  ;;  %v1450_v23 = vcombine.high %v554_v20, %v554_v20  ;;  %v1456_v31 = vcombine.low %v719_v28, %v719_v28  ;;  %v576_v20 = vld [vmem:[%s1837_s7] sm:$0x3] }
 0x15a   : > { %v434_v34 = vsel %vm424_vm1, %v422_v24, %v1444_v32  ;;  %v436_v35 = vpack.c.bf16 %v433_v33, %v433_v33  ;;  %v1690_v24 = vshrl.u32 %v563_v22, 7  ;;  %v561_v32 = vpack.i.b16 %v1449_v21, %v1449_v21 }
 0x15b   : > { %v437_v36 = vpack.c.bf16 %v434_v34, %v434_v34  ;;  %v595_v26 = vshrl.u32 %v1450_v23, 16 }
 0x15c   : > { %v444_v37 = vsel %vm442_vm2, %v436_v35, 0  ;;  %v1693_v27 = vsub.s32 0, %v1690_v24 }
 0x15d   : > { %1445 = vmatprep.subr.msk.bf16.mxu0 %vm442_vm2, %v437_v36  ;;  %v596_v30 = vpack.i.b16 %v595_v26, %v595_v26  ;;  %v953_v26 = vsub.s32 2, %v1690_v24 }
 0x15e   : > { %464 = vmatpush1.bf16.msra.mxu0 %v444_v37  ;;  %v594_v35 = vrot.slane %v589_v29, %v1693_v27  ;;  %v568_v37 = vpack.i.b16 %v1450_v23, %v1450_v23 }
 0x161   : > { %1446 = vmatmul.mubr.msk.bf16.vlgmr.msra.gmra.mxu0 %vm438_vm3, %v435_v38  ;;  %v601_v38 = vrot.slane %v596_v30, %v1693_v27 }
 0x162   : > { %699 = vmatprep.mubr.bf16.mxu0 %v1548_v4 }
 0x221   : > { %v483_v39 = vpop.f32.mrf.mxu0 }
 0x222   : > { %v490_v41 = vsel %vm442_vm2, %v483_v39, 0.0 }
 0x223   : > { %v485_v40 = vpop.f32.mrf.mxu0 }
 0x224   : > { %v491_v42 = vsel %vm442_vm2, %v485_v40, 0.0 }
 0x225   : > { %v487_v43 = vpop.f32.mrf.mxu0  ;;  %v492_v44 = vadd.f32 %v491_v42, %v490_v41  ;;  %v1702_v41 = vsub.s32 1, %v1690_v24  ;;  %v941_v42 = vld [vmem:[%s1831_s1] sm:$0x44] }
 0x226   : > { %v566_v43 = vrot.slane %v561_v32, %v1693_v27 }
 0x227   : > { %493 = vadd.xlane.f32.xlu0 %v492_v44  ;;  %v488_v45 = vpop.f32.mrf.mxu0 }
 0x23d   : > { %513 = vperm.xlu0 %1511, %v510_v46   ;;  %v806_v46 = vshrl.u32 %v1456_v31, 16 }
 0x2b0   : > { %v494_v47 = vpop.xlane.xlu0 %493 }
 0x2b1   : > { %v495_v48 = vmul.f32 0.00390625, %v494_v47 }
 0x2b3   : > { %v496_v49 = vsub.f32 %v483_v39, %v495_v48  ;;  %v497_v50 = vsub.f32 %v485_v40, %v495_v48  ;;  %v1457_v39 = vcombine.high %v719_v28, %v719_v28  ;;  %v726_v40 = vpack.i.b16 %v1456_v31, %v1456_v31 }
 0x2b5   : > { %v498_v51 = vmul.f32 %v496_v49, %v496_v49  ;;  %v499_v52 = vmul.f32 %v497_v50, %v497_v50 }
 0x2b7   : > { %v500_v53 = vsel %vm442_vm2, %v498_v51, 0.0  ;;  %v501_v54 = vsel %vm442_vm2, %v499_v52, 0.0  ;;  %v813_v51 = vshrl.u32 %v1457_v39, 16 }
 0x2b8   : > { %v502_v55 = vadd.f32 %v501_v54, %v500_v53  ;;  %v514_v61 = vpop.permute.xlu0 %513  ;;  %v733_v53 = vpack.i.b16 %v1457_v39, %v1457_v39  ;;  %v1467_v54 = vcombine.low %v941_v42, %v941_v42 }
 0x2ba   : > { %503 = vadd.xlane.f32.xlu1 %v502_v55  ;;  %v1468_v55 = vcombine.high %v941_v42, %v941_v42  ;;  %v1198_v42 = vld [vmem:[%s1831_s1 + $0x8] sm:$0x11] }
 0x2cb   : > { %521 = vperm.xlu1 %1510, %v518_v56   ;;  %v731_v56 = vrot.slane %v726_v40, %v1702_v41 }
 0x343   : > { %v504_v57 = vpop.xlane.xlu1 %503 }
 0x344   : > { %v505_v58 = vmul.f32 0.00390625, %v504_v57 }
 0x346   : > { %v506_v59 = vadd.f32 1e-06, %v505_v58  ;;  %v807_v58 = vpack.i.b16 %v806_v46, %v806_v46 }
 0x347   : > { %v522_v5 = vpop.permute.xlu1 %521 }
 0x348   : > { %1528 = vrsqrt.f32 %v506_v59 }
 0x355   : > { %v1529_v60 = vpop.eup %1528 }
 0x356   : > { %v508_v62 = vmul.f32 %v1529_v60, %v496_v49  ;;  %v509_v63 = vmul.f32 %v1529_v60, %v497_v50  ;;  %v573_v50 = vrot.slane %v568_v37, %v1693_v27 }
 0x358   : > { %v516_v2 = vmul.f32 %v514_v61, %v508_v62  ;;  %v517_v3 = vmul.f32 %v514_v61, %v509_v63  ;;  %v1030_v62 = vld [vmem:[%s1831_s1] sm:$0x88] }
 0x35a   : > { %v524_v6 = vadd.f32 %v522_v5, %v516_v2  ;;  %v525_v7 = vadd.f32 %v522_v5, %v517_v3  ;;  %v1451_v3 = vld [vmem:[%s1837_s7 + $0x2] sm:$0x3]  ;;  %v814_v5 = vpack.i.b16 %v813_v51, %v813_v51 }
 0x35c   : > { %v528_v8 = vmin.f32 %v524_v6, 0.0  ;;  %v529_v9 = vmin.f32 %v525_v7, 0.0  ;;  %vm526_vm4 = vcmp.gt.f32.partialorder %v524_v6, 0.0  ;;  %vm527_vm5 = vcmp.gt.f32.partialorder %v525_v7, 0.0 }
 0x35d   : > { %v819_v21 = vrot.slane %v814_v5, %v1702_v41 }
 0x35e   : > { %v530_v10 = vmul.f32 1.442695, %v528_v8  ;;  %v532_v11 = vmul.f32 1.442695, %v529_v9  ;;  %v948_v8 = vshrl.u32 %v1467_v54, 16  ;;  %v956_v9 = vshrl.u32 %v1468_v55, 16 }
 0x35f   : > { %v1481_v54 = vcombine.high %v1198_v42, %v1198_v42 }
 0x360   : > { %1530 = vpow2.f32 %v530_v10  ;;  %v1472_v10 = vcombine.low %v1030_v62, %v1030_v62  ;;  %v949_v25 = vpack.i.b16 %v948_v8, %v948_v8  ;;  %v957_v28 = vpack.i.b16 %v956_v9, %v956_v9 }
 0x361   : > { %1532 = vpow2.f32 %v532_v11  ;;  %v1212_v5 = vpack.i.b16 %v1481_v54, %v1481_v54 }
 0x362   : > { %v1037_v29 = vpack.i.b16 %v1472_v10, %v1472_v10  ;;  %v1117_v37 = vshrl.u32 %v1472_v10, 16  ;;  %v954_v40 = vrot.slane %v949_v25, %v953_v26  ;;  %v1469_v10 = vld [vmem:[%s1837_s7 + $0xa] sm:$0x3] }
 0x36d   : > { %v1531_v12 = vpop.eup %1530 }
 0x36e   : > { %v1533_v13 = vpop.eup %1532  ;;  %v1447_v14 = vadd.f32 -1.0, %v1531_v12  ;;  %v812_v12 = vrot.slane %v807_v58, %v1702_v41 }
 0x36f   : > { %v1448_v15 = vadd.f32 -1.0, %v1533_v13 }
 0x370   : > { %v536_v16 = vsel %vm526_vm4, %v524_v6, %v1447_v14 }
 0x371   : > { %v1667_v17 = vpack.c.bf16 %v536_v16, %v536_v16  ;;  %v537_v18 = vsel %vm527_vm5, %v525_v7, %v1448_v15  ;;  %v738_v7 = vrot.slane %v733_v53, %v1702_v41  ;;  %v1473_v15 = vcombine.high %v1030_v62, %v1030_v62 }
 0x372   : > { %v1671_v19 = vpack.c.bf16 %v537_v18, %v537_v18  ;;  %v1480_v53 = vcombine.low %v1198_v42, %v1198_v42 }
 0x373   : > { %542 = vrot.lane.b32.xlu1 %v1667_v17, %s1549_s14  ;;  %577 = vrot.lane.b32.xlu0 %v1667_v17, %s1550_s15  ;;  %v882_v41 = vsel %vm610_vm9, %v1667_v17, 0 }
 0x377   : > { %708 = vrot.lane.b32.xlu1 %v1667_v17, %s1551_s16  ;;  %579 = vrot.lane.b32.xlu0 %v1671_v19, %s1550_s15 }
 0x37b   : > { %795 = vrot.lane.b32.xlu1 %v1667_v17, %s1552_s20  ;;  %544 = vrot.lane.b32.xlu0 %v1671_v19, %s1549_s14 }
 0x37f   : > { %930 = vrot.lane.b32.xlu1 %v1667_v17, %s1553_s21  ;;  %710 = vrot.lane.b32.xlu0 %v1671_v19, %s1551_s16 }
 0x383   : > { %1019 = vrot.lane.b32.xlu1 %v1667_v17, %s1554_s22  ;;  %797 = vrot.lane.b32.xlu0 %v1671_v19, %s1552_s20 }
 0x387   : > { %1106 = vrot.lane.b32.xlu1 %v1667_v17, %s1555_s23  ;;  %932 = vrot.lane.b32.xlu0 %v1671_v19, %s1553_s21 }
 0x38b   : > { %1187 = vrot.lane.b32.xlu1 %v1667_v17, %s1556_s24  ;;  %1021 = vrot.lane.b32.xlu0 %v1671_v19, %s1554_s22  ;;  %v1461_v17 = vld [vmem:[%s1837_s7 + $0x6] sm:$0x3] }
 0x38f   : > { %1108 = vrot.lane.b32.xlu0 %v1671_v19, %s1555_s23 }
 0x393   : > { %1189 = vrot.lane.b32.xlu0 %v1671_v19, %s1556_s24 }
 0x3e5   : > { %v543_v33 = vpop.permute.xlu1 %542  ;;  %v578_v34 = vpop.permute.xlu0 %577 }
 0x3e6   : > { %v586_v36 = vsel %vm581_vm6, 0, %v578_v34  ;;  %v552_v48 = vsel %vm546_vm7, 0, %v543_v33 }
 0x3e7   : > { %v602_v47 = vmul.bf16 %v594_v35, %v586_v36  ;;  %v574_v57 = vmul.bf16 %v566_v43, %v552_v48  ;;  %v1458_v36 = vld [vmem:[%s1837_s7 + $0x4] sm:$0x3] }
 0x3e9   : > { %v709_v44 = vpop.permute.xlu1 %708  ;;  %v580_v45 = vpop.permute.xlu0 %579  ;;  %v612_v61 = vsel %vm610_vm9, %v602_v47, 0  ;;  %v662_v14 = vsel %vm610_vm9, %v574_v57, 0 }
 0x3ea   : > { %v582_v49 = vsel %vm581_vm6, %v578_v34, %v580_v45  ;;  %v717_v63 = vsel %vm712_vm8, 0, %v709_v44  ;;  %v1044_v34 = vpack.i.b16 %v1473_v15, %v1473_v15 }
 0x3eb   : > { %v603_v52 = vmul.bf16 %v601_v38, %v582_v49  ;;  %v739_v11 = vmul.bf16 %v731_v56, %v717_v63  ;;  %v1124_v38 = vshrl.u32 %v1473_v15, 16  ;;  %v1118_v49 = vpack.i.b16 %v1117_v37, %v1117_v37 }
 0x3ed   : > { %v796_v59 = vpop.permute.xlu1 %795  ;;  %1452 = vmatprep.subr.msk.bf16.mxu1 %vm610_vm9, %v603_v52  ;;  %v545_v60 = vpop.permute.xlu0 %544  ;;  %v747_v32 = vsel %vm610_vm9, %v739_v11, 0 }
 0x3ee   : > { %v547_v2 = vsel %vm546_vm7, %v543_v33, %v545_v60  ;;  %632 = vmatpush1.bf16.msra.mxu1 %v612_v61  ;;  %v804_v16 = vsel %vm799_vm10, 0, %v796_v59  ;;  %v1739_v33 = vsub.s32 3, %v1690_v24  ;;  %v962_v24 = vrot.slane %v957_v28, %v953_v26  ;;  %v1464_v61 = vld [vmem:[%s1837_s7 + $0x8] sm:$0x3]  ;;  %v1477_v26 = vld [vmem:[%s1837_s7 + $0xe] sm:$0x3] }
 0x3ef   : > { %v575_v6 = vmul.bf16 %v573_v50, %v547_v2  ;;  %v820_v30 = vmul.bf16 %v812_v12, %v804_v16  ;;  %v1125_v50 = vpack.i.b16 %v1124_v38, %v1124_v38  ;;  %v1482_v28 = vld [vmem:[%s1837_s7 + $0x10] sm:$0x3] }
 0x3f0   : > { %v1049_v46 = vrot.slane %v1044_v34, %v1739_v33 }
 0x3f1   : > { %1453 = vmatmul.mubr.msk.bf16.vlgmr.msra.gmra.mxu1 %vm606_vm11, %v1451_v3  ;;  %1454 = vmatprep.subr.msk.bf16.mxu0 %vm610_vm9, %v575_v6  ;;  %v711_v13 = vpop.permute.xlu0 %710  ;;  %v931_v22 = vpop.permute.xlu1 %930  ;;  %v828_v45 = vsel %vm610_vm9, %v820_v30, 0  ;;  %v1130_v60 = vrot.slane %v1125_v50, %v1739_v33  ;;  %v1205_v3 = vpack.i.b16 %v1480_v53, %v1480_v53 }
 0x3f2   : > { %v713_v18 = vsel %vm712_vm8, %v709_v44, %v711_v13  ;;  %682 = vmatpush1.bf16.msra.mxu0 %v662_v14  ;;  %784 = vmatprep.mubr.bf16.mxu1 %v1548_v4  ;;  %v1217_v14 = vrot.slane %v1212_v5, %v1693_v27 }
 0x3f3   : > { %v740_v23 = vmul.bf16 %v738_v7, %v713_v18  ;;  %v1210_v13 = vrot.slane %v1205_v3, %v1693_v27 }
 0x3f5   : > { %1455 = vmatmul.mubr.msk.bf16.vlgmr.msra.gmra.mxu0 %vm606_vm11, %v576_v20  ;;  %1459 = vmatprep.subr.msk.bf16.mxu1 %vm610_vm9, %v740_v23  ;;  %v798_v31 = vpop.permute.xlu0 %797  ;;  %v1020_v43 = vpop.permute.xlu1 %1019 }
 0x3f6   : > { %v800_v35 = vsel %vm799_vm10, %v796_v59, %v798_v31  ;;  %767 = vmatpush1.bf16.msra.mxu1 %v747_v32  ;;  %865 = vmatprep.mubr.bf16.mxu0 %v1548_v4  ;;  %v1123_v59 = vrot.slane %v1118_v49, %v1739_v33 }
 0x3f7   : > { %v821_v39 = vmul.bf16 %v819_v21, %v800_v35  ;;  %1465 = vmatprep.subr.msk.bf16.mxu1 %vm610_vm9, %v1671_v19  ;;  %v1042_v19 = vrot.slane %v1037_v29, %v1739_v33 }
 0x3f9   : > { %1460 = vmatmul.mubr.msk.bf16.vlgmr.msra.gmra.mxu1 %vm606_vm11, %v1458_v36  ;;  %1462 = vmatprep.subr.msk.bf16.mxu0 %vm610_vm9, %v821_v39  ;;  %v933_v44 = vpop.permute.xlu0 %932  ;;  %v1107_v62 = vpop.permute.xlu1 %1106 }
 0x3fa   : > { %v935_v47 = vsel %vm934_vm12, %v931_v22, %v933_v44  ;;  %v939_v48 = vsel %vm934_vm12, %v933_v44, 0  ;;  %848 = vmatpush1.bf16.msra.mxu0 %v828_v45  ;;  %902 = vmatpush1.bf16.msra.mxu1 %v882_v41  ;;  %v1474_v22 = vld [vmem:[%s1837_s7 + $0xc] sm:$0x3] }
 0x3fb   : > { %v963_v51 = vmul.bf16 %v954_v40, %v935_v47  ;;  %v964_v52 = vmul.bf16 %v962_v24, %v939_v48  ;;  %919 = vmatprep.mubr.bf16.mxu1 %v1548_v4 }
 0x3fd   : > { %1463 = vmatmul.mubr.msk.bf16.vlgmr.msra.gmra.mxu0 %vm606_vm11, %v1461_v17  ;;  %1470 = vmatprep.subr.msk.bf16.mxu0 %vm610_vm9, %v964_v52  ;;  %v1022_v55 = vpop.permute.xlu0 %1021  ;;  %v971_v56 = vsel %vm610_vm9, %v963_v51, 0  ;;  %v1188_v15 = vpop.permute.xlu1 %1187 }
 0x3fe   : > { %v1024_v57 = vsel %vm1023_vm13, %v1020_v43, %v1022_v55  ;;  %v1028_v58 = vsel %vm1023_vm13, %v1022_v55, 0  ;;  %991 = vmatpush1.bf16.msra.mxu0 %v971_v56  ;;  %1008 = vmatprep.mubr.bf16.mxu0 %v1548_v4 }
 0x3ff   : > { %v1050_v63 = vmul.bf16 %v1042_v19, %v1024_v57  ;;  %v1051_v2 = vmul.bf16 %v1049_v46, %v1028_v58 }
 0x401   : > { %v1109_v6 = vpop.permute.xlu0 %1108  ;;  %1466 = vmatmul.mubr.msk.bf16.vlgmr.msra.gmra.mxu1 %vm606_vm11, %v1464_v61  ;;  %1475 = vmatprep.subr.msk.bf16.mxu1 %vm610_vm9, %v1051_v2  ;;  %v1058_v7 = vsel %vm610_vm9, %v1050_v63, 0 }
 0x402   : > { %v1111_v8 = vsel %vm1110_vm14, %v1107_v62, %v1109_v6  ;;  %v1115_v9 = vsel %vm1110_vm14, %v1109_v6, 0  ;;  %1078 = vmatpush1.bf16.msra.mxu1 %v1058_v7  ;;  %1095 = vmatprep.mubr.bf16.mxu1 %v1548_v4 }
 0x403   : > { %v1131_v11 = vmul.bf16 %v1123_v59, %v1111_v8  ;;  %v1132_v12 = vmul.bf16 %v1130_v60, %v1115_v9 }
 0x405   : > { %1471 = vmatmul.mubr.msk.bf16.vlgmr.msra.gmra.mxu0 %vm606_vm11, %v1469_v10  ;;  %1478 = vmatprep.subr.msk.bf16.mxu0 %vm610_vm9, %v1132_v12  ;;  %v1190_v16 = vpop.permute.xlu0 %1189  ;;  %v1139_v18 = vsel %vm610_vm9, %v1131_v11, 0 }
 0x406   : > { %v1192_v20 = vsel %vm1191_vm15, %v1188_v15, %v1190_v16  ;;  %v1196_v21 = vsel %vm1191_vm15, %v1190_v16, 0  ;;  %1159 = vmatpush1.bf16.msra.mxu0 %v1139_v18  ;;  %1176 = vmatprep.mubr.bf16.mxu0 %v1548_v4 }
 0x407   : > { %v1218_v23 = vmul.bf16 %v1210_v13, %v1192_v20  ;;  %v1219_v25 = vmul.bf16 %v1217_v14, %v1196_v21  ;;  %v1302_v21 = vld [vmem:[%s1839_s9] sm:$0xf] }
 0x409   : > { %1476 = vmatmul.mubr.msk.bf16.vlgmr.msra.gmra.mxu1 %vm606_vm11, %v1474_v22  ;;  %1483 = vmatprep.subr.msk.bf16.mxu1 %vm610_vm9, %v1219_v25  ;;  %v1226_v27 = vsel %vm610_vm9, %v1218_v23, 0 }
 0x40a   : > { %1246 = vmatpush1.bf16.msra.mxu1 %v1226_v27  ;;  %1263 = vmatprep.mubr.bf16.mxu1 %v1548_v4 }
 0x40d   : > { %1479 = vmatmul.mubr.msk.bf16.vlgmr.msra.gmra.mxu0 %vm606_vm11, %v1477_v26 }
 0x40e   : > { %1366 = vmatprep.mubr.bf16.mxu0 %v1548_v4 }
 0x411   : > { %1484 = vmatmul.mubr.msk.bf16.vlgmr.msra.gmra.mxu1 %vm606_vm11, %v1482_v28 }
 0x4b1   : > { %v651_v29 = vpop.f32.mrf.mxu1 }
 0x4b3   : > { %v653_v30 = vpop.f32.mrf.mxu1 }
 0x4b5   : > { %v655_v31 = vpop.f32.mrf.mxu1  ;;  %v701_v32 = vpop.f32.mrf.mxu0 }
 0x4b6   : > { %v702_v45 = vadd.f32 %v701_v32, %v651_v29  ;;  %v1294_v32 = vld [vmem:[%s1838_s8] sm:$0xf] }
 0x4b7   : > { %v656_v33 = vpop.f32.mrf.mxu1  ;;  %v703_v34 = vpop.f32.mrf.mxu0 }
 0x4b8   : > { %v704_v47 = vadd.f32 %v703_v34, %v653_v30 }
 0x4b9   : > { %v705_v35 = vpop.f32.mrf.mxu0  ;;  %v786_v36 = vpop.f32.mrf.mxu1 }
 0x4ba   : > { %v793_v48 = vadd.f32 %v786_v36, %v702_v45 }
 0x4bb   : > { %v706_v37 = vpop.f32.mrf.mxu0  ;;  %v788_v38 = vpop.f32.mrf.mxu1 }
 0x4bc   : > { %v794_v50 = vadd.f32 %v788_v38, %v704_v47 }
 0x4bd   : > { %v790_v39 = vpop.f32.mrf.mxu1  ;;  %v867_v40 = vpop.f32.mrf.mxu0 }
 0x4be   : > { %v874_v51 = vadd.f32 %v867_v40, %v793_v48 }
 0x4bf   : > { %v791_v24 = vpop.f32.mrf.mxu1  ;;  %v869_v41 = vpop.f32.mrf.mxu0 }
 0x4c0   : > { %v875_v54 = vadd.f32 %v869_v41, %v794_v50 }
 0x4c1   : > { %v871_v42 = vpop.f32.mrf.mxu0  ;;  %v921_v43 = vpop.f32.mrf.mxu1 }
 0x4c2   : > { %v928_v55 = vadd.f32 %v921_v43, %v874_v51 }
 0x4c3   : > { %v872_v44 = vpop.f32.mrf.mxu0  ;;  %v923_v4 = vpop.f32.mrf.mxu1 }
 0x4c4   : > { %v929_v58 = vadd.f32 %v923_v4, %v875_v54  ;;  %v1322_v54 = vld [vmem:[%s1840_s10] sm:$0xf] }
 0x4c5   : > { %v925_v19 = vpop.f32.mrf.mxu1  ;;  %v1010_v46 = vpop.f32.mrf.mxu0 }
 0x4c6   : > { %v1017_v59 = vadd.f32 %v1010_v46, %v928_v55 }
 0x4c7   : > { %v926_v17 = vpop.f32.mrf.mxu1  ;;  %v1012_v49 = vpop.f32.mrf.mxu0 }
 0x4c8   : > { %v1018_v62 = vadd.f32 %v1012_v49, %v929_v58 }
 0x4c9   : > { %v1014_v52 = vpop.f32.mrf.mxu0  ;;  %v1097_v53 = vpop.f32.mrf.mxu1 }
 0x4ca   : > { %v1104_v63 = vadd.f32 %v1097_v53, %v1017_v59 }
 0x4cb   : > { %v1015_v56 = vpop.f32.mrf.mxu0  ;;  %v1099_v57 = vpop.f32.mrf.mxu1 }
 0x4cc   : > { %v1105_v5 = vadd.f32 %v1099_v57, %v1018_v62 }
 0x4cd   : > { %v1101_v60 = vpop.f32.mrf.mxu1  ;;  %v1178_v61 = vpop.f32.mrf.mxu0 }
 0x4ce   : > { %v1185_v6 = vadd.f32 %v1178_v61, %v1104_v63 }
 0x4cf   : > { %v1102_v2 = vpop.f32.mrf.mxu1  ;;  %v1180_v3 = vpop.f32.mrf.mxu0 }
 0x4d0   : > { %v1186_v9 = vadd.f32 %v1180_v3, %v1105_v5 }
 0x4d1   : > { %v1182_v7 = vpop.f32.mrf.mxu0  ;;  %v1265_v8 = vpop.f32.mrf.mxu1 }
 0x4d2   : > { %v1272_v10 = vadd.f32 %v1265_v8, %v1185_v6 }
 0x4d3   : > { %v1183_v11 = vpop.f32.mrf.mxu0  ;;  %v1267_v12 = vpop.f32.mrf.mxu1 }
 0x4d4   : > { %v1273_v13 = vadd.f32 %v1267_v12, %v1186_v9  ;;  %v1274_v15 = vsel %vm442_vm2, %v1272_v10, 0.0 }
 0x4d5   : > { %v1269_v14 = vpop.f32.mrf.mxu1 }
 0x4d6   : > { %v1275_v16 = vsel %vm442_vm2, %v1273_v13, 0.0 }
 0x4d7   : > { %v1270_v18 = vpop.f32.mrf.mxu1  ;;  %v1276_v20 = vadd.f32 %v1275_v16, %v1274_v15 }
 0x4d9   : > { %1277 = vadd.xlane.f32.xlu1 %v1276_v20 }
 0x4ea   : > { %1305 = vperm.xlu1 %1510, %v1302_v21  }
 0x562   : > { %v1278_v22 = vpop.xlane.xlu1 %1277 }
 0x563   : > { %v1279_v23 = vmul.f32 0.00390625, %v1278_v22 }
 0x565   : > { %v1280_v25 = vsub.f32 %v1272_v10, %v1279_v23  ;;  %v1281_v27 = vsub.f32 %v1273_v13, %v1279_v23 }
 0x566   : > { %v1306_v41 = vpop.permute.xlu1 %1305 }
 0x567   : > { %v1282_v26 = vmul.f32 %v1280_v25, %v1280_v25  ;;  %v1283_v28 = vmul.f32 %v1281_v27, %v1281_v27 }
 0x569   : > { %v1284_v29 = vsel %vm442_vm2, %v1282_v26, 0.0  ;;  %v1285_v30 = vsel %vm442_vm2, %v1283_v28, 0.0 }
 0x56a   : > { %v1286_v31 = vadd.f32 %v1285_v30, %v1284_v29 }
 0x56c   : > { %1287 = vadd.xlane.f32.xlu0 %v1286_v31 }
 0x582   : > { %1297 = vperm.xlu0 %1511, %v1294_v32  }
 0x5f5   : > { %v1288_v33 = vpop.xlane.xlu0 %1287 }
 0x5f6   : > { %v1289_v34 = vmul.f32 0.00390625, %v1288_v33 }
 0x5f8   : > { %v1290_v35 = vadd.f32 1e-06, %v1289_v34 }
 0x5fa   : > { %1534 = vrsqrt.f32 %v1290_v35 }
 0x5fd   : > { %v1298_v39 = vpop.permute.xlu0 %1297 }
 0x607   : > { %v1535_v36 = vpop.eup %1534 }
 0x608   : > { %v1292_v37 = vmul.f32 %v1535_v36, %v1280_v25  ;;  %v1293_v38 = vmul.f32 %v1535_v36, %v1281_v27 }
 0x60a   : > { %v1300_v40 = vmul.f32 %v1298_v39, %v1292_v37  ;;  %v1301_v24 = vmul.f32 %v1298_v39, %v1293_v38 }
 0x60c   : > { %v1308_v42 = vadd.f32 %v1306_v41, %v1300_v40  ;;  %v1309_v43 = vadd.f32 %v1306_v41, %v1301_v24 }
 0x60e   : > { %v1312_v44 = vmin.f32 %v1308_v42, 0.0  ;;  %v1313_v4 = vmin.f32 %v1309_v43, 0.0  ;;  %vm1310_vm0 = vcmp.gt.f32.partialorder %v1308_v42, 0.0  ;;  %vm1311_vm1 = vcmp.gt.f32.partialorder %v1309_v43, 0.0 }
 0x610   : > { %v1314_v45 = vmul.f32 1.442695, %v1312_v44  ;;  %v1316_v19 = vmul.f32 1.442695, %v1313_v4 }
 0x612   : > { %1536 = vpow2.f32 %v1314_v45 }
 0x613   : > { %1538 = vpow2.f32 %v1316_v19 }
 0x61f   : > { %v1537_v46 = vpop.eup %1536 }
 0x620   : > { %v1539_v47 = vpop.eup %1538  ;;  %v1485_v48 = vadd.f32 -1.0, %v1537_v46 }
 0x621   : > { %v1486_v17 = vadd.f32 -1.0, %v1539_v47 }
 0x622   : > { %v1320_v49 = vsel %vm1310_vm0, %v1308_v42, %v1485_v48 }
 0x623   : > { %v1321_v50 = vsel %vm1311_vm1, %v1309_v43, %v1486_v17  ;;  %v1323_v51 = vpack.c.bf16 %v1320_v49, %v1320_v49 }
 0x624   : > { %v1324_v52 = vpack.c.bf16 %v1321_v50, %v1321_v50 }
 0x625   : > { %v1329_v53 = vsel %vm610_vm9, %v1323_v51, 0 }
 0x626   : > { %1487 = vmatprep.subr.msk.bf16.mxu0 %vm610_vm9, %v1324_v52 }
 0x627   : > { %1349 = vmatpush1.bf16.msra.mxu0 %v1329_v53 }
 0x62a   : > { %1488 = vmatmul.mubr.msk.bf16.vlgmr.msra.gmra.mxu0 %vm606_vm11, %v1322_v54 }
 0x6ea   : > { %v1368_v55 = vpop.f32.mrf.mxu0 }
 0x6eb   : > { %v1375_v56 = vadd.f32 %v1368_v55, %v1633_v0 }
 0x6ec   : > { %v1370_v57 = vpop.f32.mrf.mxu0 }
 0x6ed   : > { %1377 = vst [vmem:[%s386_s29] sm:$0xff] %v1375_v56  ;;  %v1376_v58 = vadd.f32 %v1370_v57, %v1635_v1 }
 0x6ee   : > { %v1372_v59 = vpop.f32.mrf.mxu0 }
 0x6ef   : > { %1378 = vst [vmem:[%s386_s29 + $0x8] sm:$0xff] %v1376_v58 }
 0x6f0   : > { %v1373_v60 = vpop.f32.mrf.mxu0 }
 0x6f1 PF: > { %s21_s17 = sadd.s32 1, %s1546_s17  }
 0x6f2   : > { %p18_p4 = scmp.ge.s32.totalorder %s21_s17, 4  }
 0x6f4   :  { %20 = sbr.rel (!%p18_p4) target bundleno = 1 (0x1), region = 102 }

</bundles_post_ra>
